<compile_context>
chip_gen: v6e
topology: v6e:2x2x1
jax: 0.10.0
libtpu: 0.0.40
codegen_flags: <defaults>
</compile_context>

<pallas_src>
import functools

import jax
import jax.numpy as jnp
import numpy as np
from jax.experimental import pallas as pl
from jax.experimental.pallas import tpu as pltpu


def _outlayer_kernel(x_ref, mask_ref, w1_ref, b1_ref, w2_ref, b2_ref,
                     w3_ref, b3_ref, o_ref, *, W, cmid, cout):
    """One lane chunk (a whole number of images). x_ref block: (Cin, CL)."""
    CL = x_ref.shape[1]
    hp = jax.lax.Precision.HIGHEST

    # ---- Conv 1x1 + (folded) BN + ReLU  (MXU) -------------------------------
    y1 = jnp.dot(w1_ref[...], x_ref[...], precision=hp,
                 preferred_element_type=jnp.float32)
    y1 = jnp.maximum(y1 + b1_ref[...], 0.0)                     # (Cp, CL)

    # ---- Conv 3x3 (pad=1): 9 masked XLU lane-rotations + one matmul ---------
    taps = []
    k = 0
    for dy in (-1, 0, 1):
        for dx in (-1, 0, 1):
            shift = dy * W + dx
            rolled = y1 if shift == 0 else pltpu.roll(
                y1, shift=(-shift) % CL, axis=1)
            taps.append(rolled * mask_ref[k:k + 1, :])           # zero padding
            k += 1
    stacked = jnp.concatenate(taps, axis=0)                      # (9*Cp, CL)
    y2 = jnp.dot(w2_ref[...], stacked, precision=hp,
                 preferred_element_type=jnp.float32)
    y2 = jnp.maximum(y2 + b2_ref[...], 0.0)                      # (Cp, CL)

    # ---- Conv 1x1 (Cout x Cmid) + Sigmoid as VPU broadcast-FMA --------------
    rows = []
    for c in range(cout):
        row = y2[0:1, :] * w3_ref[c, 0]
        for kk in range(1, cmid):
            row = row + y2[kk:kk + 1, :] * w3_ref[c, kk]
        rows.append(jax.nn.sigmoid(row + b3_ref[c]))
    o_ref[...] = jnp.concatenate(rows, axis=0).astype(o_ref.dtype)


def outlayer_pallas(x,
                    w1, b1, bn1_g, bn1_b, bn1_m, bn1_v,
                    w2, b2, bn2_g, bn2_b, bn2_m, bn2_v,
                    w3, b3, eps=1e-5):
    """x: (B, Cin, H, W) f32. w1: (Cmid,Cin,1,1), w2: (Cmid,Cmid,3,3),
    w3: (Cout,Cmid,1,1); biases 1-D; BN params 1-D (eval-mode running stats)."""
    B, Cin, H, W = x.shape
    Cmid = w1.shape[0]
    Cout = w3.shape[0]
    L = H * W
    f32 = jnp.float32
    Cp = ((Cmid + 7) // 8) * 8          # pad mid channels to the 8-sublane tile

    # ---- Fold eval-mode BN into conv weight/bias; zero-pad mid channels -----
    s1 = bn1_g / jnp.sqrt(bn1_v + eps)
    w1f = jnp.pad((w1.reshape(Cmid, Cin) * s1[:, None]).astype(f32),
                  ((0, Cp - Cmid), (0, 0)))
    b1f = jnp.pad((s1 * (b1 - bn1_m) + bn1_b).astype(f32),
                  (0, Cp - Cmid)).reshape(Cp, 1)

    s2 = bn2_g / jnp.sqrt(bn2_v + eps)
    # im2col ordering: rows = out channel (padded), cols = (ky, kx, in-padded)
    w2_t = jnp.transpose(w2 * s2[:, None, None, None], (0, 2, 3, 1))
    w2_t = jnp.pad(w2_t, ((0, Cp - Cmid), (0, 0), (0, 0), (0, Cp - Cmid)))
    w2m = w2_t.reshape(Cp, 9 * Cp).astype(f32)
    b2f = jnp.pad((s2 * (b2 - bn2_m) + bn2_b).astype(f32),
                  (0, Cp - Cmid)).reshape(Cp, 1)

    w3f = w3.reshape(Cout, Cmid).astype(f32)       # SMEM scalars
    b3f = b3.astype(f32)                           # SMEM scalars

    # ---- Fold batch into the lane axis; split into whole-image chunks -------
    n_chunks = 2 if (B % 2 == 0 and B >= 2) else 1   # v7x: 2 parallel steps
    imgs = B // n_chunks
    CL = imgs * L
    x2 = jnp.transpose(x, (1, 0, 2, 3)).reshape(Cin, B * L).astype(f32)

    # Per-chunk boundary masks for the 9 taps (identical for every chunk).
    hh = jnp.tile(jnp.repeat(jnp.arange(H), W), imgs)
    ww = jnp.tile(jnp.tile(jnp.arange(W), H), imgs)
    masks = []
    for dy in (-1, 0, 1):
        for dx in (-1, 0, 1):
            masks.append((hh + dy >= 0) & (hh + dy < H) &
                         (ww + dx >= 0) & (ww + dx < W))
    mask = jnp.stack(masks, axis=0).astype(f32)      # (9, CL)

    out2 = pl.pallas_call(
        functools.partial(_outlayer_kernel, W=W, cmid=Cmid, cout=Cout),
        out_shape=jax.ShapeDtypeStruct((Cout, B * L), x.dtype),
        grid=(n_chunks,),
        in_specs=[
            pl.BlockSpec((Cin, CL), lambda g: (0, g)),          # x (lane-dense)
            pl.BlockSpec((9, CL), lambda g: (0, 0)),            # tap masks
            pl.BlockSpec((Cp, Cin), lambda g: (0, 0)),          # w1 (BN folded)
            pl.BlockSpec((Cp, 1), lambda g: (0, 0)),            # b1 (BN folded)
            pl.BlockSpec((Cp, 9 * Cp), lambda g: (0, 0)),       # w2 im2col (BN folded)
            pl.BlockSpec((Cp, 1), lambda g: (0, 0)),            # b2 (BN folded)
            pl.BlockSpec(memory_space=pltpu.MemorySpace.SMEM),  # w3 scalars
            pl.BlockSpec(memory_space=pltpu.MemorySpace.SMEM),  # b3 scalars
        ],
        out_specs=pl.BlockSpec((Cout, CL), lambda g: (0, g)),
        compiler_params=pltpu.CompilerParams(
            dimension_semantics=("parallel",)),
    )(x2, mask, w1f, b1f, w2m, b2f, w3f, b3f)

    return out2.reshape(Cout, B, H, W).transpose(1, 0, 2, 3)


def outlayer_ref(x,
                 w1, b1, bn1_g, bn1_b, bn1_m, bn1_v,
                 w2, b2, bn2_g, bn2_b, bn2_m, bn2_v,
                 w3, b3, eps=1e-5):
    """Pure-JAX reference (same semantics as the PyTorch forward, eval BN)."""
    dn = ('NCHW', 'OIHW', 'NCHW')
    hp = jax.lax.Precision.HIGHEST

    def bn(y, g, b, m, v):
        s = g / jnp.sqrt(v + eps)
        return y * s[None, :, None, None] + (b - m * s)[None, :, None, None]

    y = jax.lax.conv_general_dilated(x, w1, (1, 1), 'VALID',
                                     dimension_numbers=dn, precision=hp)
    y = jnp.maximum(bn(y + b1[None, :, None, None], bn1_g, bn1_b, bn1_m, bn1_v), 0.0)
    y = jax.lax.conv_general_dilated(y, w2, (1, 1), 'SAME',
                                     dimension_numbers=dn, precision=hp)
    y = jnp.maximum(bn(y + b2[None, :, None, None], bn2_g, bn2_b, bn2_m, bn2_v), 0.0)
    y = jax.lax.conv_general_dilated(y, w3, (1, 1), 'VALID',
                                     dimension_numbers=dn, precision=hp)
    return jax.nn.sigmoid(y + b3[None, :, None, None])


if __name__ == "__main__":
    # Small shapes consistent with the module (mid channels = input_channels // 5).
    B, Cin, H, W = 2, 20, 16, 16
    Cmid, Cout = Cin // 5, 2

    key = jax.random.PRNGKey(0)
    ks = jax.random.split(key, 16)

    x = jax.random.normal(ks[0], (B, Cin, H, W), dtype=jnp.float32)

    w1 = jax.random.normal(ks[1], (Cmid, Cin, 1, 1), dtype=jnp.float32) * 0.2
    b1 = 0.1 * jax.random.normal(ks[2], (Cmid,), dtype=jnp.float32)
    w2 = jax.random.normal(ks[3], (Cmid, Cmid, 3, 3), dtype=jnp.float32) * 0.2
    b2 = 0.1 * jax.random.normal(ks[4], (Cmid,), dtype=jnp.float32)
    w3 = jax.random.normal(ks[5], (Cout, Cmid, 1, 1), dtype=jnp.float32) * 0.2
    b3 = 0.1 * jax.random.normal(ks[6], (Cout,), dtype=jnp.float32)

    bn1_g = 1.0 + 0.1 * jax.random.normal(ks[7], (Cmid,), dtype=jnp.float32)
    bn1_b = 0.1 * jax.random.normal(ks[8], (Cmid,), dtype=jnp.float32)
    bn1_m = 0.1 * jax.random.normal(ks[9], (Cmid,), dtype=jnp.float32)
    bn1_v = 1.0 + jnp.abs(jax.random.normal(ks[10], (Cmid,), dtype=jnp.float32))

    bn2_g = 1.0 + 0.1 * jax.random.normal(ks[11], (Cmid,), dtype=jnp.float32)
    bn2_b = 0.1 * jax.random.normal(ks[12], (Cmid,), dtype=jnp.float32)
    bn2_m = 0.1 * jax.random.normal(ks[13], (Cmid,), dtype=jnp.float32)
    bn2_v = 1.0 + jnp.abs(jax.random.normal(ks[14], (Cmid,), dtype=jnp.float32))

    out = outlayer_pallas(x, w1, b1, bn1_g, bn1_b, bn1_m, bn1_v,
                          w2, b2, bn2_g, bn2_b, bn2_m, bn2_v, w3, b3)
    out = jax.block_until_ready(out)

    ref = outlayer_ref(x, w1, b1, bn1_g, bn1_b, bn1_m, bn1_v,
                       w2, b2, bn2_g, bn2_b, bn2_m, bn2_v, w3, b3)
    np.testing.assert_allclose(np.asarray(out), np.asarray(ref),
                               rtol=1e-5, atol=1e-5)
    print("KERNEL_OK")
</pallas_src>

<mosaic_0001>
module attributes {stable_mosaic.version = 11 : i64} {
  func.func @_outlayer_kernel(%arg0: i32, %arg1: memref<20x256xf32, #tpu.memory_space<vmem>>, %arg2: memref<9x256xf32, #tpu.memory_space<vmem>>, %arg3: memref<8x20xf32, #tpu.memory_space<vmem>>, %arg4: memref<8x1xf32, #tpu.memory_space<vmem>>, %arg5: memref<8x72xf32, #tpu.memory_space<vmem>>, %arg6: memref<8x1xf32, #tpu.memory_space<vmem>>, %arg7: memref<2x4xf32, #tpu.memory_space<smem>>, %arg8: memref<2xf32, #tpu.memory_space<smem>>, %arg9: memref<2x256xf32, #tpu.memory_space<vmem>>) attributes {dimension_semantics = [#tpu.dimension_semantics<parallel>], iteration_bounds = array<i64: 2>, scalar_prefetch = 0 : i64, scratch_operands = 0 : i64, tpu.core_type = #tpu.core_type<tc>, window_params = [{transform_indices = @transform_0, window_bounds = array<i64: 20, 256>}, {pipeline_mode = #tpu.pipeline_mode<synchronous>, transform_indices = @transform_1, window_bounds = array<i64: 9, 256>}, {pipeline_mode = #tpu.pipeline_mode<synchronous>, transform_indices = @transform_2, window_bounds = array<i64: 8, 20>}, {pipeline_mode = #tpu.pipeline_mode<synchronous>, transform_indices = @transform_3, window_bounds = array<i64: 8, 1>}, {pipeline_mode = #tpu.pipeline_mode<synchronous>, transform_indices = @transform_4, window_bounds = array<i64: 8, 72>}, {pipeline_mode = #tpu.pipeline_mode<synchronous>, transform_indices = @transform_5, window_bounds = array<i64: 8, 1>}, {transform_indices = @transform_6, window_bounds = array<i64: 2, 4>}, {transform_indices = @transform_7, window_bounds = array<i64: 2>}, {transform_indices = @transform_8, window_bounds = array<i64: 2, 256>}]} {
    %c0 = arith.constant 0 : index
    %c0_0 = arith.constant 0 : index
    %0 = vector.load %arg3[%c0, %c0_0] : memref<8x20xf32, #tpu.memory_space<vmem>>, vector<8x20xf32>
    %c0_1 = arith.constant 0 : index
    %c0_2 = arith.constant 0 : index
    %1 = vector.load %arg1[%c0_1, %c0_2] : memref<20x256xf32, #tpu.memory_space<vmem>>, vector<20x256xf32>
    %cst = arith.constant dense<0.000000e+00> : vector<8x256xf32>
    %2 = tpu.matmul %0, %1, %cst {dimension_numbers = #tpu.dot_dimension_numbers<[1], [0], [0], [1], [0, 0, 1, 1], [], []>, precision = #tpu.contract_precision<fp32>} : vector<8x20xf32>, vector<20x256xf32>, vector<8x256xf32> -> vector<8x256xf32>
    %c0_3 = arith.constant 0 : index
    %c0_4 = arith.constant 0 : index
    %3 = vector.load %arg4[%c0_3, %c0_4] : memref<8x1xf32, #tpu.memory_space<vmem>>, vector<8x1xf32>
    %4 = vector.broadcast %3 : vector<8x1xf32> to vector<8x256xf32>
    %5 = arith.addf %2, %4 : vector<8x256xf32>
    %cst_5 = arith.constant 0.000000e+00 : f32
    %6 = vector.broadcast %cst_5 : f32 to vector<8x256xf32>
    %7 = arith.maximumf %5, %6 : vector<8x256xf32>
    %c17_i32 = arith.constant 17 : i32
    %8 = tpu.dynamic_rotate %7 by %c17_i32 dim 1 : vector<8x256xf32>, i32 -> vector<8x256xf32>
    %c0_6 = arith.constant 0 : index
    %c0_7 = arith.constant 0 : index
    %9 = vector.load %arg2[%c0_6, %c0_7] : memref<9x256xf32, #tpu.memory_space<vmem>>, vector<1x256xf32>
    %10 = vector.broadcast %9 : vector<1x256xf32> to vector<8x256xf32>
    %11 = arith.mulf %8, %10 : vector<8x256xf32>
    %c16_i32 = arith.constant 16 : i32
    %12 = tpu.dynamic_rotate %7 by %c16_i32 dim 1 : vector<8x256xf32>, i32 -> vector<8x256xf32>
    %c1 = arith.constant 1 : index
    %c0_8 = arith.constant 0 : index
    %13 = vector.load %arg2[%c1, %c0_8] : memref<9x256xf32, #tpu.memory_space<vmem>>, vector<1x256xf32>
    %14 = vector.broadcast %13 : vector<1x256xf32> to vector<8x256xf32>
    %15 = arith.mulf %12, %14 : vector<8x256xf32>
    %c15_i32 = arith.constant 15 : i32
    %16 = tpu.dynamic_rotate %7 by %c15_i32 dim 1 : vector<8x256xf32>, i32 -> vector<8x256xf32>
    %c2 = arith.constant 2 : index
    %c0_9 = arith.constant 0 : index
    %17 = vector.load %arg2[%c2, %c0_9] : memref<9x256xf32, #tpu.memory_space<vmem>>, vector<1x256xf32>
    %18 = vector.broadcast %17 : vector<1x256xf32> to vector<8x256xf32>
    %19 = arith.mulf %16, %18 : vector<8x256xf32>
    %c1_i32 = arith.constant 1 : i32
    %20 = tpu.dynamic_rotate %7 by %c1_i32 dim 1 : vector<8x256xf32>, i32 -> vector<8x256xf32>
    %c3 = arith.constant 3 : index
    %c0_10 = arith.constant 0 : index
    %21 = vector.load %arg2[%c3, %c0_10] : memref<9x256xf32, #tpu.memory_space<vmem>>, vector<1x256xf32>
    %22 = vector.broadcast %21 : vector<1x256xf32> to vector<8x256xf32>
    %23 = arith.mulf %20, %22 : vector<8x256xf32>
    %c4 = arith.constant 4 : index
    %c0_11 = arith.constant 0 : index
    %24 = vector.load %arg2[%c4, %c0_11] : memref<9x256xf32, #tpu.memory_space<vmem>>, vector<1x256xf32>
    %25 = vector.broadcast %24 : vector<1x256xf32> to vector<8x256xf32>
    %26 = arith.mulf %7, %25 : vector<8x256xf32>
    %c255_i32 = arith.constant 255 : i32
    %27 = tpu.dynamic_rotate %7 by %c255_i32 dim 1 : vector<8x256xf32>, i32 -> vector<8x256xf32>
    %c5 = arith.constant 5 : index
    %c0_12 = arith.constant 0 : index
    %28 = vector.load %arg2[%c5, %c0_12] : memref<9x256xf32, #tpu.memory_space<vmem>>, vector<1x256xf32>
    %29 = vector.broadcast %28 : vector<1x256xf32> to vector<8x256xf32>
    %30 = arith.mulf %27, %29 : vector<8x256xf32>
    %c241_i32 = arith.constant 241 : i32
    %31 = tpu.dynamic_rotate %7 by %c241_i32 dim 1 : vector<8x256xf32>, i32 -> vector<8x256xf32>
    %c6 = arith.constant 6 : index
    %c0_13 = arith.constant 0 : index
    %32 = vector.load %arg2[%c6, %c0_13] : memref<9x256xf32, #tpu.memory_space<vmem>>, vector<1x256xf32>
    %33 = vector.broadcast %32 : vector<1x256xf32> to vector<8x256xf32>
    %34 = arith.mulf %31, %33 : vector<8x256xf32>
    %c240_i32 = arith.constant 240 : i32
    %35 = tpu.dynamic_rotate %7 by %c240_i32 dim 1 : vector<8x256xf32>, i32 -> vector<8x256xf32>
    %c7 = arith.constant 7 : index
    %c0_14 = arith.constant 0 : index
    %36 = vector.load %arg2[%c7, %c0_14] : memref<9x256xf32, #tpu.memory_space<vmem>>, vector<1x256xf32>
    %37 = vector.broadcast %36 : vector<1x256xf32> to vector<8x256xf32>
    %38 = arith.mulf %35, %37 : vector<8x256xf32>
    %c239_i32 = arith.constant 239 : i32
    %39 = tpu.dynamic_rotate %7 by %c239_i32 dim 1 : vector<8x256xf32>, i32 -> vector<8x256xf32>
    %c8 = arith.constant 8 : index
    %c0_15 = arith.constant 0 : index
    %40 = vector.load %arg2[%c8, %c0_15] : memref<9x256xf32, #tpu.memory_space<vmem>>, vector<1x256xf32>
    %41 = vector.broadcast %40 : vector<1x256xf32> to vector<8x256xf32>
    %42 = arith.mulf %39, %41 : vector<8x256xf32>
    %43 = tpu.concatenate %11, %15, %19, %23, %26, %30, %34, %38, %42 in 0 : vector<8x256xf32>, vector<8x256xf32>, vector<8x256xf32>, vector<8x256xf32>, vector<8x256xf32>, vector<8x256xf32>, vector<8x256xf32>, vector<8x256xf32>, vector<8x256xf32> -> vector<72x256xf32>
    %c0_16 = arith.constant 0 : index
    %c0_17 = arith.constant 0 : index
    %44 = vector.load %arg5[%c0_16, %c0_17] : memref<8x72xf32, #tpu.memory_space<vmem>>, vector<8x72xf32>
    %cst_18 = arith.constant dense<0.000000e+00> : vector<8x256xf32>
    %45 = tpu.matmul %44, %43, %cst_18 {dimension_numbers = #tpu.dot_dimension_numbers<[1], [0], [0], [1], [0, 0, 1, 1], [], []>, precision = #tpu.contract_precision<fp32>} : vector<8x72xf32>, vector<72x256xf32>, vector<8x256xf32> -> vector<8x256xf32>
    %c0_19 = arith.constant 0 : index
    %c0_20 = arith.constant 0 : index
    %46 = vector.load %arg6[%c0_19, %c0_20] : memref<8x1xf32, #tpu.memory_space<vmem>>, vector<8x1xf32>
    %47 = vector.broadcast %46 : vector<8x1xf32> to vector<8x256xf32>
    %48 = arith.addf %45, %47 : vector<8x256xf32>
    %cst_21 = arith.constant 0.000000e+00 : f32
    %49 = vector.broadcast %cst_21 : f32 to vector<8x256xf32>
    %50 = arith.maximumf %48, %49 : vector<8x256xf32>
    %51 = vector.extract_strided_slice %50 {offsets = [0, 0], sizes = [1, 256], strides = [1, 1]} : vector<8x256xf32> to vector<1x256xf32>
    %c0_22 = arith.constant 0 : index
    %c0_23 = arith.constant 0 : index
    %52 = memref.load %arg7[%c0_22, %c0_23] : memref<2x4xf32, #tpu.memory_space<smem>>
    %53 = vector.broadcast %52 : f32 to vector<1x256xf32>
    %54 = arith.mulf %51, %53 : vector<1x256xf32>
    %55 = vector.extract_strided_slice %50 {offsets = [1, 0], sizes = [1, 256], strides = [1, 1]} : vector<8x256xf32> to vector<1x256xf32>
    %c0_24 = arith.constant 0 : index
    %c1_25 = arith.constant 1 : index
    %56 = memref.load %arg7[%c0_24, %c1_25] : memref<2x4xf32, #tpu.memory_space<smem>>
    %57 = vector.broadcast %56 : f32 to vector<1x256xf32>
    %58 = arith.mulf %55, %57 : vector<1x256xf32>
    %59 = arith.addf %54, %58 : vector<1x256xf32>
    %60 = vector.extract_strided_slice %50 {offsets = [2, 0], sizes = [1, 256], strides = [1, 1]} : vector<8x256xf32> to vector<1x256xf32>
    %c0_26 = arith.constant 0 : index
    %c2_27 = arith.constant 2 : index
    %61 = memref.load %arg7[%c0_26, %c2_27] : memref<2x4xf32, #tpu.memory_space<smem>>
    %62 = vector.broadcast %61 : f32 to vector<1x256xf32>
    %63 = arith.mulf %60, %62 : vector<1x256xf32>
    %64 = arith.addf %59, %63 : vector<1x256xf32>
    %65 = vector.extract_strided_slice %50 {offsets = [3, 0], sizes = [1, 256], strides = [1, 1]} : vector<8x256xf32> to vector<1x256xf32>
    %c0_28 = arith.constant 0 : index
    %c3_29 = arith.constant 3 : index
    %66 = memref.load %arg7[%c0_28, %c3_29] : memref<2x4xf32, #tpu.memory_space<smem>>
    %67 = vector.broadcast %66 : f32 to vector<1x256xf32>
    %68 = arith.mulf %65, %67 : vector<1x256xf32>
    %69 = arith.addf %64, %68 : vector<1x256xf32>
    %c0_30 = arith.constant 0 : index
    %70 = memref.load %arg8[%c0_30] : memref<2xf32, #tpu.memory_space<smem>>
    %71 = vector.broadcast %70 : f32 to vector<1x256xf32>
    %72 = arith.addf %69, %71 : vector<1x256xf32>
    %73 = arith.negf %72 : vector<1x256xf32>
    %74 = math.exp %73 : vector<1x256xf32>
    %cst_31 = arith.constant 1.000000e+00 : f32
    %75 = vector.broadcast %cst_31 : f32 to vector<1x256xf32>
    %76 = arith.addf %75, %74 : vector<1x256xf32>
    %77 = arith.divf %75, %76 : vector<1x256xf32>
    %78 = vector.extract_strided_slice %50 {offsets = [0, 0], sizes = [1, 256], strides = [1, 1]} : vector<8x256xf32> to vector<1x256xf32>
    %c1_32 = arith.constant 1 : index
    %c0_33 = arith.constant 0 : index
    %79 = memref.load %arg7[%c1_32, %c0_33] : memref<2x4xf32, #tpu.memory_space<smem>>
    %80 = vector.broadcast %79 : f32 to vector<1x256xf32>
    %81 = arith.mulf %78, %80 : vector<1x256xf32>
    %82 = vector.extract_strided_slice %50 {offsets = [1, 0], sizes = [1, 256], strides = [1, 1]} : vector<8x256xf32> to vector<1x256xf32>
    %c1_34 = arith.constant 1 : index
    %c1_35 = arith.constant 1 : index
    %83 = memref.load %arg7[%c1_34, %c1_35] : memref<2x4xf32, #tpu.memory_space<smem>>
    %84 = vector.broadcast %83 : f32 to vector<1x256xf32>
    %85 = arith.mulf %82, %84 : vector<1x256xf32>
    %86 = arith.addf %81, %85 : vector<1x256xf32>
    %87 = vector.extract_strided_slice %50 {offsets = [2, 0], sizes = [1, 256], strides = [1, 1]} : vector<8x256xf32> to vector<1x256xf32>
    %c1_36 = arith.constant 1 : index
    %c2_37 = arith.constant 2 : index
    %88 = memref.load %arg7[%c1_36, %c2_37] : memref<2x4xf32, #tpu.memory_space<smem>>
    %89 = vector.broadcast %88 : f32 to vector<1x256xf32>
    %90 = arith.mulf %87, %89 : vector<1x256xf32>
    %91 = arith.addf %86, %90 : vector<1x256xf32>
    %92 = vector.extract_strided_slice %50 {offsets = [3, 0], sizes = [1, 256], strides = [1, 1]} : vector<8x256xf32> to vector<1x256xf32>
    %c1_38 = arith.constant 1 : index
    %c3_39 = arith.constant 3 : index
    %93 = memref.load %arg7[%c1_38, %c3_39] : memref<2x4xf32, #tpu.memory_space<smem>>
    %94 = vector.broadcast %93 : f32 to vector<1x256xf32>
    %95 = arith.mulf %92, %94 : vector<1x256xf32>
    %96 = arith.addf %91, %95 : vector<1x256xf32>
    %c1_40 = arith.constant 1 : index
    %97 = memref.load %arg8[%c1_40] : memref<2xf32, #tpu.memory_space<smem>>
    %98 = vector.broadcast %97 : f32 to vector<1x256xf32>
    %99 = arith.addf %96, %98 : vector<1x256xf32>
    %100 = arith.negf %99 : vector<1x256xf32>
    %101 = math.exp %100 : vector<1x256xf32>
    %cst_41 = arith.constant 1.000000e+00 : f32
    %102 = vector.broadcast %cst_41 : f32 to vector<1x256xf32>
    %103 = arith.addf %102, %101 : vector<1x256xf32>
    %104 = arith.divf %102, %103 : vector<1x256xf32>
    %105 = tpu.concatenate %77, %104 in 0 : vector<1x256xf32>, vector<1x256xf32> -> vector<2x256xf32>
    %c0_42 = arith.constant 0 : index
    %c0_43 = arith.constant 0 : index
    %106 = vector.load %arg9[%c0_42, %c0_43] : memref<2x256xf32, #tpu.memory_space<vmem>>, vector<2x256xf32>
    tpu.vector_store %arg9[%c0_42, %c0_43], %105 {strides = array<i32>} : memref<2x256xf32, #tpu.memory_space<vmem>>, vector<2x256xf32>,
    return
  }
  func.func @transform_0(%arg0: i32) -> (i32, i32) {
    %c0_i32 = arith.constant 0 : i32
    %c0_i32_0 = arith.constant 0 : i32
    return %c0_i32, %arg0 : i32, i32
  }
  func.func @transform_1(%arg0: i32) -> (i32, i32) {
    %c0_i32 = arith.constant 0 : i32
    %c0_i32_0 = arith.constant 0 : i32
    %c0_i32_1 = arith.constant 0 : i32
    return %c0_i32, %c0_i32_0 : i32, i32
  }
  func.func @transform_2(%arg0: i32) -> (i32, i32) {
    %c0_i32 = arith.constant 0 : i32
    %c0_i32_0 = arith.constant 0 : i32
    %c0_i32_1 = arith.constant 0 : i32
    return %c0_i32, %c0_i32_0 : i32, i32
  }
  func.func @transform_3(%arg0: i32) -> (i32, i32) {
    %c0_i32 = arith.constant 0 : i32
    %c0_i32_0 = arith.constant 0 : i32
    %c0_i32_1 = arith.constant 0 : i32
    return %c0_i32, %c0_i32_0 : i32, i32
  }
  func.func @transform_4(%arg0: i32) -> (i32, i32) {
    %c0_i32 = arith.constant 0 : i32
    %c0_i32_0 = arith.constant 0 : i32
    %c0_i32_1 = arith.constant 0 : i32
    return %c0_i32, %c0_i32_0 : i32, i32
  }
  func.func @transform_5(%arg0: i32) -> (i32, i32) {
    %c0_i32 = arith.constant 0 : i32
    %c0_i32_0 = arith.constant 0 : i32
    %c0_i32_1 = arith.constant 0 : i32
    return %c0_i32, %c0_i32_0 : i32, i32
  }
  func.func @transform_6(%arg0: i32) -> (i32, i32) {
    %c0_i32 = arith.constant 0 : i32
    %c0_i32_0 = arith.constant 0 : i32
    %c0_i32_1 = arith.constant 0 : i32
    return %c0_i32, %c0_i32_0 : i32, i32
  }
  func.func @transform_7(%arg0: i32) -> i32 {
    %c0_i32 = arith.constant 0 : i32
    %c0_i32_0 = arith.constant 0 : i32
    return %c0_i32 : i32
  }
  func.func @transform_8(%arg0: i32) -> (i32, i32) {
    %c0_i32 = arith.constant 0 : i32
    %c0_i32_0 = arith.constant 0 : i32
    return %c0_i32, %arg0 : i32, i32
  }
}

</mosaic_0001>

<bundles_post_ra>
// kernel: tpu_custom_call.1
= control target key start
LH: loop header
LB: loop body
LE: loop exit
PB: predicated region body
PF: predicated region fallthrough
CT: control target
= control target key end

     0   :  { %s3117_s0 = inlined_call_operand.hbm [shape: f32[20,512], index: 0, kind: input, shape index: {}]   ;;  %s3118_s1 = inlined_call_operand.hbm [shape: f32[9,256], index: 1, kind: input, shape index: {}]   ;;  %s3119_s2 = inlined_call_operand.vmem [shape: f32[8,20], index: 2, kind: input, shape index: {}]   ;;  %s3120_s3 = inlined_call_operand.vmem [shape: f32[8,1], index: 3, kind: input, shape index: {}]   ;;  %s3121_s4 = inlined_call_operand.vmem [shape: f32[8,72], index: 4, kind: input, shape index: {}]   ;;  %s3122_s5 = inlined_call_operand.vmem [shape: f32[8,1], index: 5, kind: input, shape index: {}]   ;;  %s3123_s6 = inlined_call_operand.vmem [shape: f32[2,4], index: 6, kind: input, shape index: {}]   ;;  %s3124_s7 = inlined_call_operand.vmem [shape: f32[2], index: 7, kind: input, shape index: {}]   ;;  %s3125_s8 = inlined_call_operand.hbm [shape: f32[2,512], index: 8, kind: output, shape index: {}]  }
   0x1   :  { %3140 = sst [smem:[#allocation17_spill]] %s3118_s1 }
   0x2   :  { %3141 = sst [smem:[#allocation18_spill]] %s3123_s6 }
   0x3   :  { %13 = vsyncpa [#allocation3], 0 }
   0x4   :  { %15 = vsyncpa [#allocation3 + $0x1], 0 }
   0x5   :  { %16 = vsyncpa [#allocation7], 0 }
   0x6   :  { %17 = vsyncpa [#allocation5], 0 }
   0x7   :  { %18 = vsyncpa [#allocation10], 0 }
   0x8   :  { %19 = vsyncpa [#allocation4], 0 }
   0x9   :  { %21 = vsyncpa [#allocation4 + $0x1], 0  ;;  %s2407_s27 = smov 0   ;;  %s2409_s28 = smov 0  }
   0xa   :  { %s2411_s29 = smov 0   ;;  %s2413_s30 = smov 0  }
   0xb LB: > { %s2428_s9 = sadd.s32 4294967295, %s2342_s30   ;;  %s2039_s10 = sadd.s32 4294967294, %s2342_s30   ;;  %s2342_s30 = sphi %s2413_s30, %s3175_s30   ;;  %s2338_s29 = sphi %s2411_s29, %s3174_s29   ;;  %s2334_s28 = sphi %s2409_s28, %s3173_s28   ;;  %s2330_s27 = sphi %s2407_s27, %s3172_s27  }
   0xc   : > { %s2432_s11 = sadd.s32 1, %s2342_s30   ;;  %s34_s12 = sadd.s32 1, %s2338_s29 }
   0xd   : > { %s31_s13 = ssub.s32 %s2342_s30, %s2432_s11  ;;  %p41_p0 = scmp.ne.s32.totalorder %s2338_s29, %s2334_s28 }
   0xe   : > { %p32_p1 = scmp.eq.s32.totalorder %s31_s13, 0  ;;  %p42_p2 = scmp.eq.s32.totalorder %s2342_s30, 0 }
   0xf   : > { %p47_p3 = scmp.ne.s32.totalorder %s2334_s28, %s2330_s27  ;;  %p3126_p4 = scmp.eq.s32.totalorder %s2428_s9, 0 }
  0x10   : > { %s2444_s14 = scalar_select %p32_p1, %s2338_s29, %s34_s12  }
  0x11   : > { %p2446_p5 = por %p42_p2, %p41_p0  ;;  %p2452_p6 = por %p3126_p4, %p47_p3 }
  0x12   : > { %p218_p7 = scmp.eq.s32.totalorder %s2428_s9, 1  ;;  %p224_p8 = scmp.eq.s32.totalorder %s2039_s10, 1 }
  0x13   : > { %s3143_s16 = scalar_select %p2452_p6, 1, 0 }
  0x14   : > { %p2040_p9 = scmp.ge.s32.totalorder %s2342_s30, 1  ;;  %p231_p10 = scmp.lt.s32.totalorder %s2342_s30, 3 }
  0x15   : > { %p2459_p11 = por %p218_p7, %p41_p0  ;;  %p2463_p12 = por %p224_p8, %p47_p3 }
  0x16   : > { %p2467_p13 = pnand %p2040_p9, %p231_p10  ;;  %s2344_s20 = smov [#allocation6]  }
  0x17   : > { %s3144_s17 = scalar_select %p2459_p11, 1, 0 }
  0x18   : > { %s3145_s18 = scalar_select %p2463_p12, 1, 0 }
  0x19   : > { %s3146_s19 = scalar_select %p2467_p13, 1, 0 }
  0x1a   : > { %p2090_p1 = pneg %p2467_p13  ;;  %s243_s21 = sshll.u32 %s2344_s20, 4  ;;  %s244_s21 = int_to_ptr.vmem [resolvable:$true] %s243_s21 }
  0x1b   : > { %p2111_p3 = scmp.lt.s32.totalorder %s2342_s30, 2  ;;  %s3148_s6 = sld [smem:[#allocation18_spill]] }
  0x1c   : > { %p2475_p2 = pnand %p2090_p1, %p3126_p4  ;;  %s2193_s26 = scalar_lea.vmem %s244_s21, 512 }
  0x1d   : > { %p2194_p8 = scmp.ne.s32.totalorder %s244_s21, %s2193_s26  ;;  %p2201_p1 = scmp.lt.s32.totalorder %s244_s21, %s244_s21 }
  0x1e   : > { %p2184_p7 = pneg %p2475_p2  ;;  %p2202_p4 = scmp.lt.s32.totalorder %s2193_s26, %s2193_s26 }
  0x20   : > { %p2196_p9 = pnand %p2194_p8, %p2184_p7  ;;  %p2203_p12 = por %p2202_p4, %p2201_p1 }
  0x21   : > { %s269_s25 = sshll.u32 %s3148_s6, 4  ;;  %s270_s25 = int_to_ptr.vmem [resolvable:$true] %s269_s25 }
  0x22   : > { %p2197_p10 = pneg %p2196_p9 }
  0x24   : > { %p2204_p11 = pnand %p2203_p12, %p2197_p10 }
  0x26   : > { %2207 = shalt.err (!%p2204_p11)
}
  0x27   : > { %s3128_s10 = smov 256   ;;  %s3129_s12 = smov 16  }
  0x28   : > { %s3149_s1 = sld [smem:[#allocation17_spill]]  ;;  %p2501_p8 = pnand %p2111_p3, %p2446_p5 }
  0x29   : > { %s2208_s24 = scalar_lea.vmem %s270_s25, 32  ;;  %p2216_p9 = scmp.lt.s32.totalorder %s270_s25, %s270_s25 }
  0x2a   : > { %p2209_p4 = scmp.ne.s32.totalorder %s270_s25, %s2208_s24  ;;  %p2217_p10 = scmp.lt.s32.totalorder %s2208_s24, %s2208_s24 }
  0x2c   : > { %p2211_p11 = pnand %p2209_p4, %p2184_p7  ;;  %p2218_p1 = por %p2217_p10, %p2216_p9 }
  0x2e   : > { %2093 = dma.hbm_to_vmem [thread:$0]  (!%p2475_p2), %s3149_s1, 512, %s244_s21, [#allocation7], %s3128_s10, %s3128_s10, %s3129_s12  }
  0x2f   : > { %p2212_p12 = pneg %p2211_p11 }
  0x31   : > { %p2219_p0 = pnand %p2218_p1, %p2212_p12 }
  0x33   : > { %2222 = shalt.err (!%p2219_p0)
}
  0x34   : > { %s2347_s26 = smov [#allocation8]   ;;  %s280_s13 = sshll.u32 %s3124_s7, 4  ;;  %s281_s13 = int_to_ptr.vmem [resolvable:$true] %s280_s13 }
  0x35   : > { %2096 = dma.vmem_to_smem (!%p2475_p2), %s270_s25, 32, %s2347_s26, [#allocation5]  }
  0x36   : > { %s2223_s20 = scalar_lea.vmem %s281_s13, 16  ;;  %p2231_p11 = scmp.lt.s32.totalorder %s281_s13, %s281_s13 }
  0x37   : > { %p2224_p5 = scmp.ne.s32.totalorder %s281_s13, %s2223_s20  ;;  %p2232_p9 = scmp.lt.s32.totalorder %s2223_s20, %s2223_s20 }
  0x39   : > { %p2226_p3 = pnand %p2224_p5, %p2184_p7  ;;  %p2233_p12 = por %p2232_p9, %p2231_p11 }
  0x3b   : > { %p2227_p4 = pneg %p2226_p3 }
  0x3d   : > { %p2234_p0 = pnand %p2233_p12, %p2227_p4 }
  0x3f   : > { %2237 = shalt.err (!%p2234_p0)
}
  0x40   : > { %s2348_s24 = smov [#allocation9]   ;;  %s291_s25 = sand.u32 1, %s2338_s29  }
  0x41   : > { %2099 = dma.vmem_to_smem (!%p2475_p2), %s281_s13, 16, %s2348_s24, [#allocation10]  }
  0x42   : > { %s2070_s26 = sshll.u32 %s2342_s30, 8  ;;  %s2072_s15 = smul.u32 48, %s291_s25 }
  0x43   : > { %s2523_s12 = scalar_lea.hbm %s3117_s0, %s2070_s26  ;;  %s2527_s22 = scalar_lea.sflag [#allocation3], %s291_s25 }
  0x44   : > { %s295_s20 = scalar_lea.vmem [#allocation2], %s2072_s15  ;;  %s2238_s6 = scalar_lea.hbm %s2523_s12, 768 }
  0x45   : > { %s302_s1 = sshll.u32 %s295_s20, 4  ;;  %p2239_p7 = scmp.ne.s32.totalorder %s2523_s12, %s2238_s6  ;;  %s2525_s1 = int_to_ptr.vmem [resolvable:$true] %s302_s1 }
  0x46   : > { %p2240_p2 = pneg %p2501_p8  ;;  %s2243_s10 = scalar_lea.hbm %s3117_s0, 1536 }
  0x47   : > { %p2244_p5 = scmp.lt.s32.totalorder %s2523_s12, %s3117_s0  ;;  %p2245_p3 = scmp.lt.s32.totalorder %s2243_s10, %s2238_s6 }
  0x48   : > { %p2241_p10 = pnand %p2240_p2, %p2239_p7 }
  0x49   : > { %p2246_p4 = por %p2245_p3, %p2244_p5 }
  0x4a   : > { %p2242_p1 = pneg %p2241_p10 }
  0x4c   : > { %p2247_p11 = pnand %p2246_p4, %p2242_p1 }
  0x4e   : > { %2250 = shalt.err (!%p2247_p11)
}
  0x4f   : > { %s2251_s25 = scalar_lea.vmem %s2525_s1, 768  ;;  %s2349_s15 = smov [#allocation2]  }
  0x50   : > { %p2252_p9 = scmp.ne.s32.totalorder %s2525_s1, %s2251_s25  ;;  %s2256_s20 = sshll.u32 %s2349_s15, 4  ;;  %s2257_s20 = int_to_ptr.vmem [resolvable:$false] %s2256_s20 }
  0x51   : > { %s2258_s13 = scalar_lea.vmem %s2257_s20, 1536  ;;  %p2259_p7 = scmp.lt.s32.totalorder %s2525_s1, %s2257_s20 }
  0x52   : > { %p2254_p12 = pnand %p2252_p9, %p2240_p2  ;;  %p2260_p10 = scmp.lt.s32.totalorder %s2258_s13, %s2251_s25 }
  0x54   : > { %p2255_p0 = pneg %p2254_p12  ;;  %p2261_p6 = por %p2260_p10, %p2259_p7 }
  0x56   : > { %p2262_p13 = pnand %p2261_p6, %p2255_p0 }
  0x58   : > { %2265 = shalt.err (!%p2262_p13)
}
  0x59   : > { %s2350_s6 = smov 512   ;;  %s3151_s24 = smov 16  }
  0x5a   : > { %s3152_s10 = smov 256   ;;  %p3153_p2 = scmp.ne.s32.totalorder %s3146_s19, 0 }
  0x5b   : > { %2103 = dma.hbm_to_vmem [thread:$0]  (!%p2501_p8), %s2523_s12, 768, %s2525_s1, %s2527_s22, %s2350_s6, %s3152_s10, %s3151_s24  }
  0x5c   : > { %314 = sbr.rel (%p3153_p2) target bundleno = 804 (0x324), region = 52  ;;  %s2553_s26 = sand.u32 (!%p3153_p2), 1, %s2334_s28  }
  0x5d   : > { %s2073_s21 = smul.u32 (!%p3153_p2), 48, %s2553_s26  ;;  %s317_s25 = scalar_lea.sflag (!%p3153_p2), [#allocation3], %s2553_s26 }
  0x5e   : > { %p3154_p6 = scmp.ne.s32.totalorder (!%p3153_p2), %s3143_s16, 0 }
  0x5f   : > { %s320_s15 = scalar_lea.vmem (!%p3153_p2), [#allocation2], %s2073_s21 }
  0x61   : > { %2309 = dma.done.wait (%p3154_p6), %s317_s25, 768  }
  0x62   : > { %2311 = vsyncadd (%p3154_p6), %s317_s25, 4294966528  ;;  %p3155_p13 = scmp.eq.s32.totalorder %s2428_s9, 0 }
  0x64   : > { %2313 = dma.done.wait (%p3155_p13), [#allocation7], 512   ;;  %p3156_p8 = pmov %p3155_p13 }
  0x66   : > { %2315 = vsyncadd (%p3156_p8), [#allocation7], 4294966784  ;;  %p3157_p1 = pmov %p3156_p8 }
  0x68   : > { %2317 = dma.done.wait (%p3157_p1), [#allocation5], 32   ;;  %p3158_p5 = pmov %p3157_p1 }
  0x69   : > { %p3159_p3 = pmov %p3157_p1 }
  0x6a   : > { %2319 = vsyncadd (%p3158_p5), [#allocation5], 4294967264 }
  0x6b   : > { %2321 = dma.done.wait (%p3159_p3), [#allocation10], 16   ;;  %p3160_p4 = pmov %p3157_p1 }
  0x6d   : > { %2323 = vsyncadd (%p3160_p4), [#allocation10], 4294967280 }
  0x6e   : > { %337 = sfence }
  0x6f   : > { %v374_v0 = vld [vmem:[%s320_s15 + $0x28] sm:$0xf]  ;;  %vm385_vm0 = vcmask 1043456   ;;  %v373_v1 = vld [vmem:[%s320_s15 + $0x20] sm:$0xf]  ;;  %v372_v2 = vld [vmem:[%s320_s15 + $0x18] sm:$0xff] }
  0x70   : > { %v390_v3 = vsel %vm385_vm0, %v374_v0, 0  ;;  %v387_v4 = vsel %vm385_vm0, %v373_v1, 0  ;;  %v2573_v5 = vand.u32 4294901760, %v372_v2  ;;  %v371_v6 = vld [vmem:[%s320_s15 + $0x10] sm:$0xff]  ;;  %v370_v7 = vld [vmem:[%s320_s15 + $0x8] sm:$0xff]  ;;  %v369_v8 = vld [vmem:[%s320_s15] sm:$0xff] }
  0x71   : > { %v2575_v9 = vand.u32 4294901760, %v390_v3  ;;  %v2577_v10 = vand.u32 4294901760, %v387_v4  ;;  %v2579_v11 = vand.u32 4294901760, %v371_v6  ;;  %v2581_v12 = vand.u32 4294901760, %v370_v7  ;;  %v368_v13 = vld [vmem:[%s3119_s2] sm:$0xff]  ;;  %s2353_s23 = smov 112  }
  0x72   : > { %v2586_v14 = vand.u32 4294901760, %v369_v8  ;;  %v2589_v15 = vsub.f32 %v372_v2, %v2573_v5  ;;  %vm381_vm1 = vcmask 162816   ;;  %v2351_v18 = vmov 0.0   ;;  %v375_v25 = vld [vmem:[%s3120_s3] sm:$0xff]  ;;  %s2354_s22 = smov 111   ;;  %s2355_s20 = smov 113  }
  0x73   : > { %419 = vmatprep.subr.mxu0 %v2575_v9  ;;  %v501_v16 = vsub.f32 %v390_v3, %v2575_v9  ;;  %v507_v17 = vsub.f32 %v387_v4, %v2577_v10  ;;  %462 = vmatprep.mubr.f32.mxu0 %v2351_v18  ;;  %v383_v19 = vsel %vm381_vm1, %v368_v13, 0  ;;  %v2596_v20 = vsub.f32 %v371_v6, %v2579_v11  ;;  %s2356_s13 = smov 127   ;;  %s2357_s6 = smov 1  }
  0x74   : > { %421 = vmatpush1.msra.mxu0 %v2577_v10  ;;  %v514_v21 = vand.u32 4294901760, %v2589_v15  ;;  %v2600_v22 = vand.u32 4294901760, %v383_v19  ;;  %v525_v23 = vsub.f32 %v370_v7, %v2581_v12  ;;  %v531_v24 = vsub.f32 %v369_v8, %v2586_v14  ;;  %568 = vmatprep.mubr.f32.mxu1 %v2351_v18  ;;  %s2358_s24 = smov 15   ;;  %s2359_s10 = smov 16  }
  0x75   : > { %423 = vmatprep.subr.mxu0 %v2573_v5  ;;  %v502_v26 = vand.u32 4294901760, %v501_v16  ;;  %v508_v27 = vand.u32 4294901760, %v507_v17  ;;  %v520_v28 = vand.u32 4294901760, %v2596_v20  ;;  %v2352_v33 = vmov 0   ;;  %s2360_s21 = smov 17   ;;  %s3051_s19 = sld [smem:[#allocation8]] }
  0x76   : > { %425 = vmatpush1.msra.mxu0 %v2579_v11  ;;  %v515_v29 = vsub.f32 %v2589_v15, %v514_v21  ;;  %v464_v30 = vsub.f32 %v383_v19, %v2600_v22  ;;  %v526_v31 = vand.u32 4294901760, %v525_v23  ;;  %v532_v32 = vand.u32 4294901760, %v531_v24  ;;  %2164 = vset.pattern.permute.xlu0 %v2352_v33  ;;  %s3053_s12 = sld [smem:[#allocation8 + $0x1]]  ;;  %s2051_s25 = sshll.u32 %s2553_s26, 2 }
  0x77   : > { %427 = vmatprep.subr.mxu0 %v2581_v12  ;;  %v503_v34 = vsub.f32 %v501_v16, %v502_v26  ;;  %v509_v35 = vsub.f32 %v507_v17, %v508_v27  ;;  %v521_v36 = vsub.f32 %v2596_v20, %v520_v28  ;;  %378 = vperm.xlu0 %2164, %v375_v25   ;;  %vm1110_vm2 = vcmask 588800   ;;  %s2071_s15 = sshll.u32 %s2428_s9, 6  ;;  %s365_s1 = scalar_lea.vmem [#allocation11], %s2051_s25 }
  0x78   : > { %429 = vmatpush1.msra.mxu0 %v2586_v14  ;;  %v465_v37 = vand.u32 4294901760, %v464_v30  ;;  %v527_v38 = vsub.f32 %v525_v23, %v526_v31  ;;  %v533_v39 = vsub.f32 %v531_v24, %v532_v32  ;;  %2165 = vset.pattern.permute.xlu1 %v2352_v33  ;;  %v516_v42 = vand.u32 4294901760, %v515_v29  ;;  %s1937_s16 = sshll.u32 %s365_s1, 4  ;;  %p3169_p9 = scmp.ne.s32.totalorder %s3144_s17, 0  ;;  %s1938_s16 = int_to_ptr.vmem [resolvable:$true] %s1937_s16 }
  0x79   : > { %v504_v40 = vand.u32 4294901760, %v503_v34  ;;  %v510_v41 = vand.u32 4294901760, %v509_v35  ;;  %604 = vmatprep.subr.mxu0 %v501_v16  ;;  %v522_v44 = vand.u32 4294901760, %v521_v36  ;;  %v1001_v16 = vld [vmem:[#allocation6 + $0x4] ss:$8 sm:$0x3] }
  0x7a   : > { %v466_v43 = vsub.f32 %v464_v30, %v465_v37  ;;  %v528_v45 = vand.u32 4294901760, %v527_v38  ;;  %v534_v47 = vand.u32 4294901760, %v533_v39  ;;  %v1023_v39 = vld [vmem:[#allocation6 + $0x5] ss:$8 sm:$0x3]  ;;  %vm1907_vm11 = vcmask 1040384  }
  0x7b   : > { %505 = vmatprep.subr.mxu1 %v504_v40 }
  0x7c   : > { %511 = vmatpush1.msra.mxu1 %v510_v41  ;;  %v467_v46 = vand.u32 4294901760, %v466_v43 }
  0x7d   : > { %517 = vmatprep.subr.mxu1 %v516_v42 }
  0x7e   : > { %468 = vmatmul.mubr.f32.vlgmr.msra.gmra.mxu0 %v467_v46  ;;  %523 = vmatpush1.msra.mxu1 %v522_v44  ;;  %v2679_v44 = vld [vmem:[#allocation6 + $0x3] ss:$8 sm:$0x3] }
  0x7f   : > { %607 = vmatpush1.msra.mxu0 %v507_v17  ;;  %529 = vmatprep.subr.mxu1 %v528_v45 }
  0x80   : > { %610 = vmatprep.subr.mxu0 %v2589_v15  ;;  %535 = vmatpush1.msra.mxu1 %v534_v47  ;;  %v2685_v47 = vld [vmem:[#allocation6 + $0x2] ss:$8 sm:$0x3] }
  0x81   : > { %613 = vmatpush1.msra.mxu0 %v2596_v20  ;;  %570 = vmatmul.mubr.f32.vlgmr.msra.gmra.mxu1 %v2600_v22 }
  0x82   : > { %616 = vmatprep.subr.mxu0 %v525_v23  ;;  %688 = vmatprep.subr.mxu1 %v2575_v9 }
  0x83   : > { %619 = vmatpush1.msra.mxu0 %v531_v24  ;;  %652 = vmatprep.mubr.f32.mxu0 %v2351_v18 }
  0x84   : > { %690 = vmatpush1.msra.mxu1 %v2577_v10  ;;  %655 = vmatmul.mubr.f32.vlgmr.msra.gmra.mxu0 %v464_v30  ;;  %v1045_v30 = vld [vmem:[#allocation6 + $0x6] ss:$8 sm:$0x3] }
  0x85   : > { %692 = vmatprep.subr.mxu1 %v2573_v5  ;;  %770 = vmatprep.subr.mxu0 %v502_v26  ;;  %v1067_v26 = vld [vmem:[#allocation6 + $0x7] ss:$8 sm:$0x3] }
  0x86   : > { %694 = vmatpush1.msra.mxu1 %v2579_v11  ;;  %774 = vmatpush1.msra.mxu0 %v508_v27 }
  0x87   : > { %696 = vmatprep.subr.mxu1 %v2581_v12  ;;  %778 = vmatprep.subr.mxu0 %v514_v21 }
  0x88   : > { %698 = vmatpush1.msra.mxu1 %v2586_v14  ;;  %731 = vmatprep.mubr.f32.mxu1 %v2351_v18 }
  0x89   : > { %782 = vmatpush1.msra.mxu0 %v520_v28  ;;  %735 = vmatmul.mubr.f32.vlgmr.msra.gmra.mxu1 %v465_v37 }
  0x8a   : > { %786 = vmatprep.subr.mxu0 %v526_v31  ;;  %858 = vmatprep.subr.mxu1 %v2575_v9  ;;  %v2657_v31 = vld [vmem:[#allocation6 + $0x10] ss:$8 sm:$0x3] }
  0x8b   : > { %790 = vmatpush1.msra.mxu0 %v532_v32  ;;  %823 = vmatprep.mubr.f32.mxu0 %v2351_v18 }
  0x8c   : > { %860 = vmatpush1.msra.mxu1 %v2577_v10  ;;  %825 = vmatmul.mubr.f32.vlgmr.msra.gmra.mxu0 %v2600_v22 }
  0x8d   : > { %862 = vmatprep.subr.mxu1 %v2573_v5  ;;  %901 = vmatprep.mubr.f32.mxu1 %v2351_v18 }
  0x8e   : > { %864 = vmatpush1.msra.mxu1 %v2579_v11  ;;  %1196 = vmatprep.mubr.f32.mxu0 %v2351_v18  ;;  %v1104_v11 = vld [vmem:[%s3122_s5] sm:$0xff] }
  0x8f   : > { %866 = vmatprep.subr.mxu1 %v2581_v12  ;;  %v915_v12 = vlaneseq }
  0x90   : > { %868 = vmatpush1.msra.mxu1 %v2586_v14 }
  0x91   : > { %903 = vmatmul.mubr.f32.vlgmr.msra.gmra.mxu1 %v2600_v22  ;;  %v923_v13 = vshrl.u32 %v915_v12, 7  ;;  %v1103_v22 = vld [vmem:[%s3121_s4] sm:$0xff]  ;;  %v2655_v25 = vand.u32 127, %v915_v12 }
  0x92   : > { %1362 = vmatprep.mubr.f32.mxu1 %v2351_v18  ;;  %v1112_v27 = vsel %vm1110_vm2, %v1103_v22, 0 }
  0x93   : > { %v2642_v14 = vsub.s32 0, %v923_v13  ;;  %v2644_v15 = vsub.s32 1, %v923_v13  ;;  %vm1063_vm3 = vcmp.lt.s32.totalorder %v2655_v25, 112  ;;  %v2668_v36 = vand.u32 4294901760, %v1112_v27 }
  0x94   : > { %vm1041_vm4 = vcmp.lt.s32.totalorder %v2655_v25, 113  ;;  %vm1085_vm5 = vcmp.lt.s32.totalorder %v2655_v25, 111  ;;  %vm1019_vm6 = vcmp.lt.s32.totalorder %v2655_v25, 127  ;;  %vm982_vm7 = vcmp.lt.s32.totalorder %v2655_v25, 1 }
  0x95   : > { %v1010_v17 = vrot.slane %v1001_v16, %v2644_v15  ;;  %v1006_v19 = vrot.slane %v1001_v16, %v2642_v14  ;;  %v1072_v34 = vrot.slane %v1067_v26, %v2642_v14  ;;  %v1076_v35 = vrot.slane %v1067_v26, %v2644_v15 }
  0x96   : > { %v1050_v37 = vrot.slane %v1045_v30, %v2642_v14  ;;  %v1054_v38 = vrot.slane %v1045_v30, %v2644_v15  ;;  %v1094_v42 = vrot.slane %v2657_v31, %v2642_v14  ;;  %v1098_v43 = vrot.slane %v2657_v31, %v2644_v15 }
  0x97   : > { %vm960_vm8 = vcmp.lt.s32.totalorder %v2655_v25, 15  ;;  %vm938_vm9 = vcmp.lt.s32.totalorder %v2655_v25, 16  ;;  %vm917_vm10 = vcmp.lt.s32.totalorder %v2655_v25, 17 }
  0xf2   : > { %v379_v48 = vpop.permute.xlu0 %378 }
 0x13e   : > { %v469_v49 = vpop.f32.mrf.mxu0 }
 0x13f   : > { %v470_v50 = vadd.f32 %v469_v49, %v379_v48 }
 0x140   : > { %v471_v51 = vpop.f32.mrf.mxu0 }
 0x141   : > { %v571_v52 = vpop.f32.mrf.mxu1  ;;  %v472_v53 = vadd.f32 %v471_v51, %v379_v48 }
 0x142   : > { %v572_v54 = vadd.f32 %v571_v52, %v470_v50  ;;  %v1028_v52 = vrot.slane %v1023_v39, %v2642_v14 }
 0x143   : > { %v573_v55 = vpop.f32.mrf.mxu1 }
 0x144   : > { %v656_v56 = vpop.f32.mrf.mxu0  ;;  %v574_v57 = vadd.f32 %v573_v55, %v472_v53  ;;  %v2691_v53 = vsub.f32 %v1112_v27, %v2668_v36  ;;  %v991_v55 = vrot.slane %v2679_v44, %v2642_v14 }
 0x145   : > { %v657_v58 = vadd.f32 %v656_v56, %v572_v54  ;;  %v1032_v54 = vrot.slane %v1023_v39, %v2644_v15  ;;  %v995_v56 = vrot.slane %v2679_v44, %v2644_v15 }
 0x146   : > { %v658_v59 = vpop.f32.mrf.mxu0 }
 0x147   : > { %v659_v62 = vadd.f32 %v658_v59, %v574_v57  ;;  %v2699_v57 = vld [vmem:[#allocation6 + $0x1] ss:$8 sm:$0x3] }
 0x149   : > { %v736_v60 = vpop.f32.mrf.mxu1 }
 0x14a   : > { %v737_v63 = vadd.f32 %v736_v60, %v657_v58 }
 0x14b   : > { %v738_v61 = vpop.f32.mrf.mxu1 }
 0x14c   : > { %v826_v0 = vpop.f32.mrf.mxu0  ;;  %v739_v1 = vadd.f32 %v738_v61, %v659_v62  ;;  %v969_v62 = vrot.slane %v2685_v47, %v2642_v14 }
 0x14d   : > { %v827_v3 = vadd.f32 %v826_v0, %v737_v63  ;;  %v973_v63 = vrot.slane %v2685_v47, %v2644_v15  ;;  %v2709_v0 = vld [vmem:[#allocation6] ss:$8 sm:$0x3] }
 0x14e   : > { %v828_v2 = vpop.f32.mrf.mxu0  ;;  %v925_v12 = vrot.slane %v2709_v0, %v2642_v14 }
 0x14f   : > { %v829_v5 = vadd.f32 %v828_v2, %v739_v1 }
 0x151   : > { %v904_v4 = vpop.f32.mrf.mxu1 }
 0x152   : > { %v905_v6 = vadd.f32 %v904_v4, %v827_v3 }
 0x153   : > { %v906_v7 = vpop.f32.mrf.mxu1 }
 0x154   : > { %v909_v8 = vmax.f32 %v905_v6, 0.0  ;;  %v907_v9 = vadd.f32 %v906_v7, %v829_v5 }
 0x156   : > { %1059 = vrot.lane.b32.xlu1 %v909_v8, %s2353_s23  ;;  %1081 = vrot.lane.b32.xlu0 %v909_v8, %s2354_s22  ;;  %v910_v10 = vmax.f32 %v907_v9, 0.0  ;;  %v1013_v21 = vmul.f32 %v1006_v19, %v909_v8 }
 0x158   : > { %v1014_v20 = vmul.f32 %v1010_v17, %v910_v10  ;;  %v2653_v24 = vand.u32 4294901760, %v1013_v21 }
 0x15a   : > { %1037 = vrot.lane.b32.xlu1 %v909_v8, %s2355_s20  ;;  %1061 = vrot.lane.b32.xlu0 %v910_v10, %s2353_s23  ;;  %v2651_v23 = vand.u32 4294901760, %v1014_v20  ;;  %v2660_v32 = vsub.f32 %v1013_v21, %v2653_v24  ;;  %v929_v21 = vrot.slane %v2709_v0, %v2644_v15  ;;  %s3055_s23 = sld [smem:[#allocation8 + $0x2]] }
 0x15c   : > { %v2663_v33 = vsub.f32 %v1014_v20, %v2651_v23  ;;  %v3132_v49 = vand.u32 4294901760, %v2660_v32 }
 0x15e   : > { %1015 = vrot.lane.b32.xlu1 %v909_v8, %s2356_s13  ;;  %1039 = vrot.lane.b32.xlu0 %v910_v10, %s2355_s20  ;;  %v3133_v48 = vand.u32 4294901760, %v2663_v33  ;;  %v2723_v4 = vsub.f32 %v2660_v32, %v3132_v49  ;;  %s3059_s20 = sld [smem:[#allocation8 + $0x80]] }
 0x160   : > { %v2718_v3 = vsub.f32 %v2663_v33, %v3133_v48 }
 0x162   : > { %1083 = vrot.lane.b32.xlu1 %v910_v10, %s2354_s22  ;;  %1017 = vrot.lane.b32.xlu0 %v910_v10, %s2356_s13  ;;  %v1274_v0 = vand.u32 4294901760, %v2718_v3  ;;  %s3057_s22 = sld [smem:[#allocation8 + $0x3]] }
 0x163   : > { %s3061_s13 = sld [smem:[#allocation8 + $0x81]] }
 0x166   : > { %978 = vrot.lane.b32.xlu1 %v909_v8, %s2357_s6  ;;  %980 = vrot.lane.b32.xlu0 %v910_v10, %s2357_s6  ;;  %s3063_s6 = sld [smem:[#allocation8 + $0x82]] }
 0x16a   : > { %956 = vrot.lane.b32.xlu1 %v909_v8, %s2358_s24  ;;  %958 = vrot.lane.b32.xlu0 %v910_v10, %s2358_s24  ;;  %s3065_s24 = sld [smem:[#allocation8 + $0x83]] }
 0x16e   : > { %934 = vrot.lane.b32.xlu1 %v909_v8, %s2359_s10  ;;  %936 = vrot.lane.b32.xlu0 %v910_v10, %s2359_s10  ;;  %s3067_s10 = sld [smem:[#allocation9]] }
 0x172   : > { %911 = vrot.lane.b32.xlu1 %v909_v8, %s2360_s21  ;;  %913 = vrot.lane.b32.xlu0 %v910_v10, %s2360_s21  ;;  %v3134_v8 = vand.u32 4294901760, %v2691_v53  ;;  %v947_v10 = vrot.slane %v2699_v57, %v2642_v14  ;;  %s3078_s21 = sld [smem:[#allocation9 + $0x1]] }
 0x176   : > { %1107 = vperm.xlu1 %2165, %v1104_v11   ;;  %v951_v11 = vrot.slane %v2699_v57, %v2644_v15 }
 0x1c8   : > { %v1060_v28 = vpop.permute.xlu1 %1059  ;;  %v1082_v29 = vpop.permute.xlu0 %1081 }
 0x1cc   : > { %v1038_v40 = vpop.permute.xlu1 %1037  ;;  %v1062_v41 = vpop.permute.xlu0 %1061 }
 0x1cd   : > { %v1064_v45 = vsel %vm1063_vm3, %v1060_v28, %v1062_v41  ;;  %v1065_v46 = vsel %vm1063_vm3, %v1062_v41, %v1060_v28 }
 0x1ce   : > { %v1079_v50 = vmul.f32 %v1072_v34, %v1064_v45  ;;  %v1080_v51 = vmul.f32 %v1076_v35, %v1065_v46  ;;  %v2761_v35 = vsub.f32 %v2691_v53, %v3134_v8 }
 0x1d0   : > { %v2701_v58 = vand.u32 4294901760, %v1080_v51  ;;  %v2703_v59 = vand.u32 4294901760, %v1079_v50  ;;  %v1016_v60 = vpop.permute.xlu1 %1015  ;;  %v1040_v61 = vpop.permute.xlu0 %1039 }
 0x1d1   : > { %v1042_v1 = vsel %vm1041_vm4, %v1038_v40, %v1040_v61  ;;  %v1043_v2 = vsel %vm1041_vm4, %v1040_v61, %v1038_v40 }
 0x1d2   : > { %v2726_v5 = vsub.f32 %v1080_v51, %v2701_v58  ;;  %v1057_v6 = vmul.f32 %v1050_v37, %v1042_v1  ;;  %v1058_v7 = vmul.f32 %v1054_v38, %v1043_v2  ;;  %v2731_v9 = vsub.f32 %v1079_v50, %v2703_v59 }
 0x1d4   : > { %v2739_v13 = vand.u32 4294901760, %v1058_v7  ;;  %v2741_v16 = vand.u32 4294901760, %v1057_v6  ;;  %v1084_v17 = vpop.permute.xlu1 %1083  ;;  %v1018_v19 = vpop.permute.xlu0 %1017  ;;  %v3138_v20 = vand.u32 4294901760, %v2726_v5 }
 0x1d5   : > { %v1086_v22 = vsel %vm1085_vm5, %v1082_v29, %v1084_v17  ;;  %v1087_v26 = vsel %vm1085_vm5, %v1084_v17, %v1082_v29  ;;  %v1020_v27 = vsel %vm1019_vm6, %v1016_v60, %v1018_v19  ;;  %v1021_v28 = vsel %vm1019_vm6, %v1018_v19, %v1016_v60 }
 0x1d6   : > { %v2755_v30 = vsub.f32 %v1058_v7, %v2739_v13  ;;  %v1101_v31 = vmul.f32 %v1094_v42, %v1086_v22  ;;  %v1102_v34 = vmul.f32 %v1098_v43, %v1087_v26  ;;  %v3137_v29 = vand.u32 4294901760, %v2731_v9 }
 0x1d7   : > { %v2765_v37 = vsub.f32 %v1057_v6, %v2741_v16  ;;  %v1035_v38 = vmul.f32 %v1028_v52, %v1020_v27  ;;  %v1036_v39 = vmul.f32 %v1032_v54, %v1021_v28  ;;  %v2774_v44 = vsub.f32 %v2726_v5, %v3138_v20 }
 0x1d8   : > { %v2767_v40 = vand.u32 4294901760, %v1102_v34  ;;  %v2769_v41 = vand.u32 4294901760, %v1101_v31  ;;  %v979_v42 = vpop.permute.xlu1 %978  ;;  %v981_v43 = vpop.permute.xlu0 %980  ;;  %v3136_v45 = vand.u32 4294901760, %v2755_v30  ;;  %v2804_v17 = vsub.f32 %v2731_v9, %v3137_v29 }
 0x1d9   : > { %v2777_v46 = vand.u32 4294901760, %v1036_v39  ;;  %v2779_v50 = vand.u32 4294901760, %v1035_v38  ;;  %v983_v51 = vsel %vm982_vm7, %v979_v42, %v981_v43  ;;  %v984_v52 = vsel %vm982_vm7, %v981_v43, %v979_v42 }
 0x1da   : > { %v2786_v54 = vsub.f32 %v1102_v34, %v2767_v40  ;;  %v2789_v60 = vsub.f32 %v1101_v31, %v2769_v41  ;;  %v998_v61 = vmul.f32 %v991_v55, %v984_v52  ;;  %v999_v1 = vmul.f32 %v995_v56, %v983_v51  ;;  %1129 = vmatprep.subr.mxu0 %v2767_v40 }
 0x1db   : > { %v3135_v2 = vand.u32 4294901760, %v2765_v37  ;;  %v2795_v6 = vsub.f32 %v1036_v39, %v2777_v46  ;;  %v2798_v7 = vsub.f32 %v1035_v38, %v2779_v50  ;;  %1131 = vmatpush1.msra.mxu0 %v2769_v41  ;;  %v1238_v38 = vand.u32 4294901760, %v2774_v44 }
 0x1dc   : > { %v1230_v55 = vand.u32 4294901760, %v2789_v60  ;;  %v2807_v56 = vand.u32 4294901760, %v999_v1  ;;  %v2809_v19 = vand.u32 4294901760, %v998_v61  ;;  %v957_v22 = vpop.permute.xlu1 %956  ;;  %1133 = vmatprep.subr.mxu0 %v2701_v58  ;;  %v959_v26 = vpop.permute.xlu0 %958  ;;  %v1224_v27 = vand.u32 4294901760, %v2786_v54 }
 0x1dd   : > { %v3139_v28 = vand.u32 4294901760, %v2798_v7  ;;  %v961_v31 = vsel %vm960_vm8, %v957_v22, %v959_v26  ;;  %v962_v34 = vsel %vm960_vm8, %v959_v26, %v957_v22  ;;  %1135 = vmatpush1.msra.mxu0 %v2703_v59  ;;  %v1249_v51 = vsub.f32 %v2755_v30, %v3136_v45 }
 0x1de   : > { %v2821_v39 = vsub.f32 %v998_v61, %v2809_v19  ;;  %v976_v42 = vmul.f32 %v969_v62, %v962_v34  ;;  %v977_v43 = vmul.f32 %v973_v63, %v961_v31  ;;  %1137 = vmatprep.subr.mxu0 %v2739_v13  ;;  %v2834_v52 = vsub.f32 %v999_v1, %v2807_v56 }
 0x1df   : > { %1139 = vmatpush1.msra.mxu0 %v2741_v16  ;;  %v1225_v44 = vsub.f32 %v2786_v54, %v1224_v27  ;;  %v1231_v47 = vsub.f32 %v2789_v60, %v1230_v55  ;;  %v1255_v62 = vsub.f32 %v2765_v37, %v3135_v2  ;;  %v1260_v31 = vand.u32 4294901760, %v2795_v6 }
 0x1e0   : > { %v1290_v63 = vand.u32 4294901760, %v2821_v39  ;;  %v2847_v61 = vand.u32 4294901760, %v977_v43  ;;  %v2849_v1 = vand.u32 4294901760, %v976_v42  ;;  %v935_v22 = vpop.permute.xlu1 %934  ;;  %1141 = vmatprep.subr.mxu0 %v2777_v46  ;;  %v937_v26 = vpop.permute.xlu0 %936  ;;  %v1244_v20 = vand.u32 4294901760, %v2804_v17 }
 0x1e1   : > { %v939_v34 = vsel %vm938_vm9, %v935_v22, %v937_v26  ;;  %v940_v49 = vsel %vm938_vm9, %v937_v26, %v935_v22  ;;  %1143 = vmatpush1.msra.mxu0 %v2779_v50  ;;  %v1226_v48 = vand.u32 4294901760, %v1225_v44  ;;  %v1232_v8 = vand.u32 4294901760, %v1231_v47 }
 0x1e2   : > { %v2859_v2 = vsub.f32 %v976_v42, %v2849_v1  ;;  %v954_v45 = vmul.f32 %v947_v10, %v940_v49  ;;  %v955_v29 = vmul.f32 %v951_v11, %v939_v34  ;;  %1145 = vmatprep.subr.mxu0 %v2651_v23  ;;  %v2870_v22 = vsub.f32 %v977_v43, %v2847_v61 }
 0x1e3   : > { %1227 = vmatprep.subr.mxu1 %v1226_v48  ;;  %1147 = vmatpush1.msra.mxu0 %v2653_v24  ;;  %v1261_v42 = vsub.f32 %v2795_v6, %v1260_v31  ;;  %v1267_v49 = vsub.f32 %v2798_v7, %v3139_v28  ;;  %v1284_v57 = vand.u32 4294901760, %v2834_v52  ;;  %v1250_v48 = vand.u32 4294901760, %v1249_v51 }
 0x1e4   : > { %v2880_v10 = vand.u32 4294901760, %v955_v29  ;;  %v2882_v11 = vand.u32 4294901760, %v954_v45  ;;  %1233 = vmatpush1.msra.mxu1 %v1232_v8  ;;  %v912_v17 = vpop.permute.xlu1 %911  ;;  %v914_v43 = vpop.permute.xlu0 %913  ;;  %1149 = vmatprep.subr.mxu0 %v2807_v56  ;;  %v1256_v44 = vand.u32 4294901760, %v1255_v62  ;;  %v1302_v47 = vand.u32 4294901760, %v2859_v2 }
 0x1e5   : > { %1239 = vmatprep.subr.mxu1 %v1238_v38  ;;  %v918_v26 = vsel %vm917_vm10, %v912_v17, %v914_v43  ;;  %v919_v34 = vsel %vm917_vm10, %v914_v43, %v912_v17  ;;  %1151 = vmatpush1.msra.mxu0 %v2809_v19  ;;  %v1291_v8 = vsub.f32 %v2821_v39, %v1290_v63  ;;  %v1262_v62 = vand.u32 4294901760, %v1261_v42 }
 0x1e6   : > { %v2895_v28 = vsub.f32 %v955_v29, %v2880_v10  ;;  %v2898_v51 = vsub.f32 %v954_v45, %v2882_v11  ;;  %v932_v38 = vmul.f32 %v925_v12, %v919_v34  ;;  %v933_v25 = vmul.f32 %v929_v21, %v918_v26  ;;  %1245 = vmatpush1.msra.mxu1 %v1244_v20 }
 0x1e7   : > { %1153 = vmatprep.subr.mxu0 %v2847_v61  ;;  %1251 = vmatprep.subr.mxu1 %v1250_v48  ;;  %v1268_v17 = vand.u32 4294901760, %v1267_v49  ;;  %v1285_v29 = vsub.f32 %v2834_v52, %v1284_v57  ;;  %v1296_v45 = vand.u32 4294901760, %v2870_v22  ;;  %v1280_v20 = vand.u32 4294901760, %v2723_v4 }
 0x1e8   : > { %v1314_v43 = vand.u32 4294901760, %v2898_v51  ;;  %v2912_v14 = vand.u32 4294901760, %v933_v25  ;;  %v2914_v12 = vand.u32 4294901760, %v932_v38  ;;  %1155 = vmatpush1.msra.mxu0 %v2849_v1  ;;  %1257 = vmatpush1.msra.mxu1 %v1256_v44  ;;  %v1308_v15 = vand.u32 4294901760, %v2895_v28 }
 0x1e9   : > { %1157 = vmatprep.subr.mxu0 %v2880_v10  ;;  %1263 = vmatprep.subr.mxu1 %v1262_v62  ;;  %v1297_v21 = vsub.f32 %v2870_v22, %v1296_v45  ;;  %v1201_v48 = vand.u32 4294901760, %v2761_v35  ;;  %v1303_v3 = vsub.f32 %v2859_v2, %v1302_v47  ;;  %v1286_v4 = vand.u32 4294901760, %v1285_v29 }
 0x1ea   : > { %v2925_v42 = vsub.f32 %v933_v25, %v2912_v14  ;;  %v2928_v49 = vsub.f32 %v932_v38, %v2914_v12  ;;  %1159 = vmatpush1.msra.mxu0 %v2882_v11  ;;  %1269 = vmatpush1.msra.mxu1 %v1268_v17  ;;  %v1309_v44 = vsub.f32 %v2895_v28, %v1308_v15  ;;  %v1292_v34 = vand.u32 4294901760, %v1291_v8 }
 0x1eb   : > { %1161 = vmatprep.subr.mxu0 %v2912_v14  ;;  %1275 = vmatprep.subr.mxu1 %v1274_v0  ;;  %v1315_v35 = vsub.f32 %v2898_v51, %v1314_v43  ;;  %v1298_v25 = vand.u32 4294901760, %v1297_v21  ;;  %v1304_v62 = vand.u32 4294901760, %v1303_v3  ;;  %v3162_v3 = vand.u32 4294901760, %v2731_v9 }
 0x1ec   : > { %v1326_v26 = vand.u32 4294901760, %v2928_v49  ;;  %1163 = vmatpush1.msra.mxu0 %v2914_v12  ;;  %1281 = vmatpush1.msra.mxu1 %v1280_v20  ;;  %v1320_v38 = vand.u32 4294901760, %v2925_v42  ;;  %v1310_v29 = vand.u32 4294901760, %v1309_v44 }
 0x1ed   : > { %1287 = vmatprep.subr.mxu1 %v1286_v4  ;;  %1386 = vmatprep.subr.mxu0 %v2786_v54  ;;  %v1316_v0 = vand.u32 4294901760, %v1315_v35  ;;  %v3163_v54 = vand.u32 4294901760, %v2755_v30 }
 0x1ee   : > { %1202 = vmatmul.mubr.f32.vlgmr.msra.gmra.mxu0 %v1201_v48  ;;  %1293 = vmatpush1.msra.mxu1 %v1292_v34  ;;  %v1321_v17 = vsub.f32 %v2925_v42, %v1320_v38  ;;  %v1327_v8 = vsub.f32 %v2928_v49, %v1326_v26  ;;  %v3161_v48 = vand.u32 4294901760, %v2726_v5 }
 0x1ef   : > { %1389 = vmatpush1.msra.mxu0 %v2789_v60  ;;  %1299 = vmatprep.subr.mxu1 %v1298_v25  ;;  %v3164_v60 = vand.u32 4294901760, %v2765_v37 }
 0x1f0   : > { %1392 = vmatprep.subr.mxu0 %v2726_v5  ;;  %1305 = vmatpush1.msra.mxu1 %v1304_v62  ;;  %v1322_v20 = vand.u32 4294901760, %v1321_v17  ;;  %v1328_v21 = vand.u32 4294901760, %v1327_v8  ;;  %v3165_v5 = vand.u32 4294901760, %v2798_v7 }
 0x1f1   : > { %1395 = vmatpush1.msra.mxu0 %v2731_v9  ;;  %1311 = vmatprep.subr.mxu1 %v1310_v29  ;;  %v3166_v9 = vand.u32 4294901760, %v2691_v53 }
 0x1f2   : > { %1398 = vmatprep.subr.mxu0 %v2755_v30  ;;  %1317 = vmatpush1.msra.mxu1 %v1316_v0  ;;  %v3167_v30 = vand.u32 4294901760, %v2663_v33 }
 0x1f3   : > { %1401 = vmatpush1.msra.mxu0 %v2765_v37  ;;  %1323 = vmatprep.subr.mxu1 %v1322_v20  ;;  %v3168_v37 = vand.u32 4294901760, %v2660_v32 }
 0x1f4   : > { %1404 = vmatprep.subr.mxu0 %v2795_v6  ;;  %1329 = vmatpush1.msra.mxu1 %v1328_v21 }
 0x1f5   : > { %1407 = vmatpush1.msra.mxu0 %v2798_v7  ;;  %1364 = vmatmul.mubr.f32.vlgmr.msra.gmra.mxu1 %v2668_v36 }
 0x1f6   : > { %1410 = vmatprep.subr.mxu0 %v2663_v33  ;;  %1494 = vmatprep.subr.mxu1 %v2767_v40 }
 0x1f7   : > { %1413 = vmatpush1.msra.mxu0 %v2660_v32  ;;  %1496 = vmatpush1.msra.mxu1 %v2769_v41 }
 0x1f8   : > { %1416 = vmatprep.subr.mxu0 %v2834_v52  ;;  %1498 = vmatprep.subr.mxu1 %v2701_v58  ;;  %v1806_v52 = vstv %s3055_s23  ;;  %s1935_s23 = scalar_lea.hbm %s3125_s8, %s2071_s15 }
 0x1f9   : > { %1419 = vmatpush1.msra.mxu0 %v2821_v39  ;;  %1500 = vmatpush1.msra.mxu1 %v2703_v59  ;;  %v1794_v39 = vstv %s3053_s12 }
 0x1fa   : > { %1422 = vmatprep.subr.mxu0 %v2870_v22  ;;  %1502 = vmatprep.subr.mxu1 %v2739_v13 }
 0x1fb   : > { %1425 = vmatpush1.msra.mxu0 %v2859_v2  ;;  %1504 = vmatpush1.msra.mxu1 %v2741_v16 }
 0x1fc   : > { %1428 = vmatprep.subr.mxu0 %v2895_v28  ;;  %1506 = vmatprep.subr.mxu1 %v2777_v46 }
 0x1fd   : > { %1431 = vmatpush1.msra.mxu0 %v2898_v51  ;;  %1508 = vmatpush1.msra.mxu1 %v2779_v50 }
 0x1fe   : > { %1434 = vmatprep.subr.mxu0 %v2925_v42  ;;  %1510 = vmatprep.subr.mxu1 %v2651_v23 }
 0x1ff   : > { %1437 = vmatpush1.msra.mxu0 %v2928_v49  ;;  %1470 = vmatprep.mubr.f32.mxu0 %v2351_v18 }
 0x200   : > { %1512 = vmatpush1.msra.mxu1 %v2653_v24  ;;  %1473 = vmatmul.mubr.f32.vlgmr.msra.gmra.mxu0 %v2691_v53 }
 0x201   : > { %1514 = vmatprep.subr.mxu1 %v2807_v56  ;;  %1588 = vmatprep.subr.mxu0 %v1224_v27 }
 0x202   : > { %1516 = vmatpush1.msra.mxu1 %v2809_v19  ;;  %1592 = vmatpush1.msra.mxu0 %v1230_v55 }
 0x203   : > { %1518 = vmatprep.subr.mxu1 %v2847_v61  ;;  %1596 = vmatprep.subr.mxu0 %v3161_v48 }
 0x204   : > { %1520 = vmatpush1.msra.mxu1 %v2849_v1  ;;  %1600 = vmatpush1.msra.mxu0 %v3162_v3 }
 0x205   : > { %1522 = vmatprep.subr.mxu1 %v2880_v10  ;;  %1604 = vmatprep.subr.mxu0 %v3163_v54 }
 0x206   : > { %1524 = vmatpush1.msra.mxu1 %v2882_v11  ;;  %1608 = vmatpush1.msra.mxu0 %v3164_v60 }
 0x207   : > { %1526 = vmatprep.subr.mxu1 %v2912_v14  ;;  %1612 = vmatprep.subr.mxu0 %v1260_v31  ;;  %v1790_v31 = vstv %s3051_s19 }
 0x208   : > { %1528 = vmatpush1.msra.mxu1 %v2914_v12  ;;  %1561 = vmatprep.mubr.f32.mxu1 %v2351_v18 }
 0x209   : > { %1616 = vmatpush1.msra.mxu0 %v3165_v5  ;;  %1565 = vmatmul.mubr.f32.vlgmr.msra.gmra.mxu1 %v3166_v9 }
 0x20a   : > { %1620 = vmatprep.subr.mxu0 %v3167_v30  ;;  %1712 = vmatprep.subr.mxu1 %v2767_v40 }
 0x20b   : > { %1624 = vmatpush1.msra.mxu0 %v3168_v37  ;;  %1714 = vmatpush1.msra.mxu1 %v2769_v41 }
 0x20c   : > { %1628 = vmatprep.subr.mxu0 %v1284_v57  ;;  %1716 = vmatprep.subr.mxu1 %v2701_v58  ;;  %v1850_v57 = vstv %s3061_s13  ;;  %s2361_s13 = smov [#allocation11]  }
 0x20d   : > { %1632 = vmatpush1.msra.mxu0 %v1290_v63  ;;  %1718 = vmatpush1.msra.mxu1 %v2703_v59  ;;  %v1818_v63 = vstv %s3057_s22  ;;  %s1923_s22 = scalar_lea.sflag [#allocation4], %s2553_s26  ;;  %s2270_s9 = sshll.u32 %s2361_s13, 4  ;;  %s2271_s9 = int_to_ptr.vmem [resolvable:$false] %s2270_s9 }
 0x20e   : > { %1636 = vmatprep.subr.mxu0 %v1296_v45  ;;  %1720 = vmatprep.subr.mxu1 %v2739_v13  ;;  %p2273_p7 = scmp.lt.s32.totalorder %s1938_s16, %s2271_s9 }
 0x20f   : > { %1640 = vmatpush1.msra.mxu0 %v1302_v47  ;;  %1722 = vmatpush1.msra.mxu1 %v2741_v16 }
 0x210   : > { %1644 = vmatprep.subr.mxu0 %v1308_v15  ;;  %1724 = vmatprep.subr.mxu1 %v2777_v46 }
 0x211   : > { %1648 = vmatpush1.msra.mxu0 %v1314_v43  ;;  %1726 = vmatpush1.msra.mxu1 %v2779_v50  ;;  %v1874_v43 = vstv %s3065_s24 }
 0x212   : > { %1652 = vmatprep.subr.mxu0 %v1320_v38  ;;  %1728 = vmatprep.subr.mxu1 %v2651_v23 }
 0x213   : > { %1656 = vmatpush1.msra.mxu0 %v1326_v26  ;;  %1689 = vmatprep.mubr.f32.mxu0 %v2351_v18 }
 0x214   : > { %1730 = vmatpush1.msra.mxu1 %v2653_v24  ;;  %1691 = vmatmul.mubr.f32.vlgmr.msra.gmra.mxu0 %v2668_v36  ;;  %v1108_v24 = vpop.permute.xlu1 %1107 }
 0x215   : > { %1732 = vmatprep.subr.mxu1 %v2807_v56  ;;  %1779 = vmatprep.mubr.f32.mxu1 %v2351_v18 }
 0x216   : > { %1734 = vmatpush1.msra.mxu1 %v2809_v19 }
 0x217   : > { %1736 = vmatprep.subr.mxu1 %v2847_v61 }
 0x218   : > { %1738 = vmatpush1.msra.mxu1 %v2849_v1 }
 0x219   : > { %1740 = vmatprep.subr.mxu1 %v2880_v10  ;;  %v1846_v10 = vstv %s3059_s20  ;;  %s2266_s20 = scalar_lea.vmem %s1938_s16, 64 }
 0x21a   : > { %1742 = vmatpush1.msra.mxu1 %v2882_v11  ;;  %v1862_v11 = vstv %s3063_s6  ;;  %p2267_p11 = scmp.ne.s32.totalorder %s1938_s16, %s2266_s20  ;;  %s2272_s6 = scalar_lea.vmem %s2271_s9, 128 }
 0x21b   : > { %1744 = vmatprep.subr.mxu1 %v2912_v14  ;;  %p2274_p10 = scmp.lt.s32.totalorder %s2272_s6, %s2266_s20 }
 0x21c   : > { %1746 = vmatpush1.msra.mxu1 %v2914_v12  ;;  %v1830_v12 = vstv %s3067_s10  ;;  %p2268_p12 = pnand %p2267_p11, %p3169_p9 }
 0x21d   : > { %1781 = vmatmul.mubr.f32.vlgmr.msra.gmra.mxu1 %v2668_v36  ;;  %p2275_p2 = por %p2274_p10, %p2273_p7 }
 0x21e   : > { %p2269_p0 = pneg %p2268_p12 }
 0x220   : > { %p2276_p6 = pnand %p2275_p2, %p2269_p0 }
 0x2ae   : > { %v1203_v23 = vpop.f32.mrf.mxu0 }
 0x2af   : > { %v1204_v53 = vadd.f32 %v1203_v23, %v1108_v24 }
 0x2b0   : > { %v1205_v32 = vpop.f32.mrf.mxu0 }
 0x2b1   : > { %v1206_v59 = vadd.f32 %v1205_v32, %v1108_v24 }
 0x2b5   : > { %v1365_v18 = vpop.f32.mrf.mxu1 }
 0x2b6   : > { %v1366_v40 = vadd.f32 %v1365_v18, %v1204_v53 }
 0x2b7   : > { %v1367_v58 = vpop.f32.mrf.mxu1 }
 0x2b8   : > { %v1368_v41 = vadd.f32 %v1367_v58, %v1206_v59  ;;  %v1886_v59 = vstv %s3078_s21 }
 0x2c0   : > { %v1474_v33 = vpop.f32.mrf.mxu0 }
 0x2c1   : > { %v1475_v46 = vadd.f32 %v1474_v33, %v1366_v40 }
 0x2c2   : > { %v1476_v13 = vpop.f32.mrf.mxu0 }
 0x2c3   : > { %v1477_v2 = vadd.f32 %v1476_v13, %v1368_v41 }
 0x2c9   : > { %v1566_v16 = vpop.f32.mrf.mxu1 }
 0x2ca   : > { %v1567_v6 = vadd.f32 %v1566_v16, %v1475_v46 }
 0x2cb   : > { %v1568_v50 = vpop.f32.mrf.mxu1 }
 0x2cc   : > { %v1569_v55 = vadd.f32 %v1568_v50, %v1477_v2 }
 0x2d4   : > { %v1692_v36 = vpop.f32.mrf.mxu0 }
 0x2d5   : > { %v1693_v56 = vadd.f32 %v1692_v36, %v1567_v6 }
 0x2d6   : > { %v1694_v7 = vpop.f32.mrf.mxu0 }
 0x2d7   : > { %v1695_v27 = vadd.f32 %v1694_v7, %v1569_v55 }
 0x2dd   : > { %v1782_v19 = vpop.f32.mrf.mxu1 }
 0x2de   : > { %v1783_v28 = vadd.f32 %v1782_v19, %v1693_v56 }
 0x2df   : > { %v1784_v61 = vpop.f32.mrf.mxu1 }
 0x2e0   : > { %v1787_v1 = vmax.f32 %v1783_v28, 0.0  ;;  %v1785_v22 = vadd.f32 %v1784_v61, %v1695_v27 }
 0x2e2   : > { %v1795_v47 = vmul.f32 %v1794_v39, %v1787_v1  ;;  %v1807_v51 = vmul.f32 %v1806_v52, %v1787_v1  ;;  %v1819_v45 = vmul.f32 %v1818_v63, %v1787_v1  ;;  %v1791_v14 = vmul.f32 %v1790_v31, %v1787_v1 }
 0x2e3   : > { %v1788_v15 = vmax.f32 %v1785_v22, 0.0  ;;  %v1851_v42 = vmul.f32 %v1850_v57, %v1787_v1  ;;  %v1847_v44 = vmul.f32 %v1846_v10, %v1787_v1  ;;  %v1863_v26 = vmul.f32 %v1862_v11, %v1787_v1 }
 0x2e4   : > { %v1799_v49 = vrot.slane %v1795_v47, 1  ;;  %v1811_v4 = vrot.slane %v1807_v51, 2  ;;  %v1823_v34 = vrot.slane %v1819_v45, 3  ;;  %v1875_v25 = vmul.f32 %v1874_v43, %v1787_v1 }
 0x2e5   : > { %v1796_v35 = vmul.f32 %v1794_v39, %v1788_v15  ;;  %v1808_v38 = vmul.f32 %v1806_v52, %v1788_v15  ;;  %v1792_v17 = vmul.f32 %v1790_v31, %v1788_v15  ;;  %v1852_v8 = vmul.f32 %v1850_v57, %v1788_v15 }
 0x2e6   : > { %v1803_v62 = vadd.f32 %v1799_v49, %v1791_v14  ;;  %v1855_v29 = vrot.slane %v1851_v42, 1  ;;  %v1820_v20 = vmul.f32 %v1818_v63, %v1788_v15  ;;  %v1848_v21 = vmul.f32 %v1846_v10, %v1788_v15 }
 0x2e7   : > { %v1800_v0 = vrot.slane %v1796_v35, 1  ;;  %v1864_v48 = vmul.f32 %v1862_v11, %v1788_v15  ;;  %v1856_v54 = vrot.slane %v1852_v8, 1  ;;  %v1867_v5 = vrot.slane %v1863_v26, 2 }
 0x2e8   : > { %v1815_v3 = vadd.f32 %v1811_v4, %v1803_v62  ;;  %v1859_v60 = vadd.f32 %v1855_v29, %v1847_v44  ;;  %v1812_v30 = vrot.slane %v1808_v38, 2  ;;  %v1876_v23 = vmul.f32 %v1874_v43, %v1788_v15 }
 0x2e9   : > { %v1804_v9 = vadd.f32 %v1800_v0, %v1792_v17  ;;  %v1868_v37 = vrot.slane %v1864_v48, 2  ;;  %v1860_v32 = vadd.f32 %v1856_v54, %v1848_v21  ;;  %v1879_v33 = vrot.slane %v1875_v25, 3 }
 0x2ea   : > { %v1827_v24 = vadd.f32 %v1823_v34, %v1815_v3  ;;  %v1871_v18 = vadd.f32 %v1867_v5, %v1859_v60  ;;  %v1824_v58 = vrot.slane %v1820_v20, 3  ;;  %v1880_v40 = vrot.slane %v1876_v23, 3 }
 0x2eb   : > { %v1816_v53 = vadd.f32 %v1812_v30, %v1804_v9  ;;  %v1872_v16 = vadd.f32 %v1868_v37, %v1860_v32 }
 0x2ec   : > { %v1831_v13 = vadd.f32 %v1830_v12, %v1827_v24  ;;  %v1883_v36 = vadd.f32 %v1879_v33, %v1871_v18 }
 0x2ed   : > { %v1828_v41 = vadd.f32 %v1824_v58, %v1816_v53  ;;  %v1884_v50 = vadd.f32 %v1880_v40, %v1872_v16 }
 0x2ee   : > { %v2055_v46 = vmul.f32 -1.442695, %v1831_v13  ;;  %v1887_v2 = vadd.f32 %v1886_v59, %v1883_v36 }
 0x2ef   : > { %v1832_v6 = vadd.f32 %v1830_v12, %v1828_v41  ;;  %v1888_v7 = vadd.f32 %v1886_v59, %v1884_v50 }
 0x2f0   : > { %v2062_v55 = vmul.f32 -1.442695, %v1887_v2  ;;  %2166 = vpow2.f32 %v2055_v46 }
 0x2f1   : > { %v2056_v56 = vmul.f32 -1.442695, %v1832_v6  ;;  %v2063_v19 = vmul.f32 -1.442695, %v1888_v7 }
 0x2f2   : > { %2168 = vpow2.f32 %v2062_v55 }
 0x2f3   : > { %2170 = vpow2.f32 %v2056_v56 }
 0x2f4   : > { %2172 = vpow2.f32 %v2063_v19 }
 0x2fd   : > { %v2167_v27 = vpop.eup %2166 }
 0x2fe   : > { %v1839_v61 = vadd.f32 1.0, %v2167_v27 }
 0x2ff   : > { %v2169_v28 = vpop.eup %2168 }
 0x300   : > { %v2171_v39 = vpop.eup %2170  ;;  %v1895_v52 = vadd.f32 1.0, %v2169_v28 }
 0x301   : > { %v2173_v63 = vpop.eup %2172  ;;  %v1840_v1 = vadd.f32 1.0, %v2171_v39 }
 0x302   : > { %v1896_v31 = vadd.f32 1.0, %v2173_v63  ;;  %2174 = vrcp.f32 %v1895_v52 }
 0x304   : > { %2176 = vrcp.f32 %v1896_v31 }
 0x305   : > { %2178 = vrcp.f32 %v1839_v61 }
 0x306   : > { %2180 = vrcp.f32 %v1840_v1 }
 0x30f   : > { %v2175_v22 = vpop.eup %2174 }
 0x310   : > { %v1903_v57 = vrot.slane %v2175_v22, 7 }
 0x311   : > { %v2177_v10 = vpop.eup %2176 }
 0x312   : > { %v2179_v11 = vpop.eup %2178  ;;  %v1904_v47 = vrot.slane %v2177_v10, 7 }
 0x313   : > { %v2181_v51 = vpop.eup %2180  ;;  %v1908_v45 = vsel %vm1907_vm11, %v2179_v11, %v1903_v57 }
 0x314   : > { %v1909_v43 = vsel %vm1907_vm11, %v2181_v51, %v1904_v47 }
 0x315   : > { %v1912_v14 = vcombine.low %v1908_v45, %v1909_v43 }
 0x317   : > { %2064 = vst.sshfl [vmem:[%s365_s1] sm:$0x33 pattern:$0x76325410] %v1912_v14 }
 0x318   : > { %2279 = shalt.err (!%p2276_p6)
}
 0x319   : > { %s2280_s24 = scalar_lea.hbm %s1935_s23, 64  ;;  %s2284_s21 = scalar_lea.hbm %s3125_s8, 128 }
 0x31a   : > { %p2281_p13 = scmp.ne.s32.totalorder %s1935_s23, %s2280_s24  ;;  %p2285_p5 = scmp.lt.s32.totalorder %s1935_s23, %s3125_s8 }
 0x31b   : > { %p2286_p3 = scmp.lt.s32.totalorder %s2284_s21, %s2280_s24 }
 0x31c   : > { %p2282_p8 = pnand %p2281_p13, %p3169_p9 }
 0x31d   : > { %p2287_p4 = por %p2286_p3, %p2285_p5 }
 0x31e   : > { %p2283_p1 = pneg %p2282_p8 }
 0x320   : > { %p2288_p11 = pnand %p2287_p4, %p2283_p1 }
 0x322   : > { %2291 = shalt.err (!%p2288_p11)
}
 0x323   : > { %2088 = dma.vmem_to_hbm [thread:$0]  (%p3169_p9), %s1938_s16, 64, %s1935_s23, %s1923_s22  }
 0x324 PF: > { %s1949_s1 = sand.u32 1, %s2330_s27   ;;  %p3170_p12 = scmp.ne.s32.totalorder %s3145_s18, 0 }
 0x325   : > { %p3171_p0 = scmp.ge.s32.totalorder %s2342_s30, 2  ;;  %s1950_s19 = scalar_lea.sflag [#allocation4], %s1949_s1 }
 0x327   : > { %p2105_p7 = pnand %p3171_p0, %p3170_p12 }
 0x329   : > { %p2106_p10 = pneg %p2105_p7 }
 0x32b   : > { %2325 = dma.done.wait (%p2106_p10), %s1950_s19, 64  }
 0x32c   : > { %2327 = vsyncadd (%p2106_p10), %s1950_s19, 4294967232  ;;  %p24_p2 = scmp.ge.s32.totalorder %s2432_s11, 4   ;;  %s3172_s27 = smov %s2334_s28 }
 0x32d   : > { %s3173_s28 = smov %s2338_s29  ;;  %s3174_s29 = smov %s2444_s14 }
 0x32e   : > { %s3175_s30 = smov %s2432_s11  ;;  %26 = sbr.rel (!%p24_p2) target bundleno = 11 (0xb), region = 118 }
 0x333   :  { %1955 = vsyncpa [#allocation3], 1 }
 0x334   :  { %1957 = vsyncpa [#allocation3 + $0x1], 1 }
 0x335   :  { %1958 = vsyncpa [#allocation7], 1 }
 0x336   :  { %1959 = vsyncpa [#allocation4], 1 }
 0x337   :  { %1961 = vsyncpa [#allocation4 + $0x1], 1 }
 0x338   :  { %1962 = vsyncpa [#allocation5], 1 }
 0x339   :  { %1964 = vsyncpa [#allocation5 + $0x1], 1 }
 0x33a   :  { %1965 = vsyncpa [#allocation10], 1 }

</bundles_post_ra>
